<compile_context>
chip_gen: v5e
topology: v5e:2x2
jax: 0.10.0
libtpu: 0.0.40
codegen_flags: <defaults>
</compile_context>

<pallas_src>
import functools
import re

import jax
import jax.numpy as jnp
from jax import lax
from jax.experimental import pallas as pl
from jax.experimental.pallas import tpu as pltpu

_MIB = 2 ** 20


# ----------------------------------------------------------------------------
# Kernel
# ----------------------------------------------------------------------------
def _embed_lookup_kernel(idx_ref, table_ref, out_ref, *, num_embed, pack,
                         row_chunk):
    """One grid step: gather `R*pack` codebook rows for one tile of indices.

    idx_ref:   (R, pack)          int32   packed token indices
    table_ref: (km, kd)           table dtype, block-diagonal packed codebook
    out_ref:   (R, kd)            table dtype, lane-dense gathered embeddings
    """
    r_total = out_ref.shape[0]
    km = pack * num_embed
    n_chunks = r_total // row_chunk

    def do_chunk(r0):
        idx = idx_ref[pl.ds(r0, row_chunk), :]                  # (rc, pack)
        # Clamp: an OOR index must not land in another token's diagonal block.
        idx = jnp.clip(idx, 0, num_embed - 1)
        lane = lax.broadcasted_iota(jnp.int32, (row_chunk, km), 1)
        # Disjoint per-j masks (idx clipped) -> OR == exact one-hot; combine
        # in bool and cast to the table dtype exactly once.
        onehot = lane == idx[:, 0:1]
        for j in range(1, pack):                                 # pack static
            onehot = jnp.logical_or(
                onehot, lane == (idx[:, j:j + 1] + j * num_embed))
        out_ref[pl.ds(r0, row_chunk), :] = jnp.dot(
            onehot.astype(table_ref.dtype), table_ref[...],
            preferred_element_type=jnp.float32,
        ).astype(out_ref.dtype)

    if n_chunks == 1:
        do_chunk(0)
    else:
        def body(c, carry):
            do_chunk(pl.multiple_of(c * row_chunk, row_chunk))
            return carry
        lax.fori_loop(0, n_chunks, body, 0, unroll=(n_chunks <= 8))


# ----------------------------------------------------------------------------
# Planning helpers
# ----------------------------------------------------------------------------
def _round_up(x, m):
    return ((x + m - 1) // m) * m


def _tpu_params():
    """(generation, num_tensorcores, vmem_capacity_bytes), with safe defaults."""
    gen = 0
    try:
        kind = jax.devices()[0].device_kind.lower()
        m = re.search(r"(\d+)", kind)
        if m:
            gen = int(m.group(1))
    except Exception:  # probe only; never fatal
        gen = 0
    vmem_cap = 64 * _MIB if gen >= 7 else 128 * _MIB
    try:
        vmem_cap = int(pltpu.get_tpu_info().vmem_capacity_bytes)
    except Exception:  # probe only; never fatal
        pass
    num_tc = 2 if gen >= 7 else 1
    return gen, num_tc, vmem_cap


def _choose_pack(num_embed, embed_dim, itemsize, lane_target, table_cap_bytes):
    """How many tokens to fold into one lane-dense output row."""
    if embed_dim % 128 == 0:
        return 1                      # already lane-dense
    if 128 % embed_dim != 0:
        return 1                      # handled by column padding instead
    pack = max(1, lane_target // embed_dim)
    # Don't let the pack^2 block-diagonal expansion blow up VMEM.
    while pack > 1 and pack * pack * num_embed * embed_dim * itemsize > table_cap_bytes:
        pack //= 2
    return max(pack, 1)


def _vmem_estimate(tn, pack, km, kd, itemsize):
    r = tn // pack
    rc = min(r, 256)                                       # row chunking bound
    table_bytes = km * kd * itemsize                       # resident once
    pipelined = 2 * (r * pack * 4 + r * kd * itemsize)     # idx + out, 2 bufs
    temps = rc * km * 4 + rc * kd * 4                      # one-hot + f32 acc
    return table_bytes + pipelined + temps


def _choose_tile(n, pack, km, kd, itemsize, budget_bytes, num_tc):
    """Pick the index-tile size `tn` (tokens per grid step)."""
    granule = 8 * pack                 # keeps R = tn//pack sublane-aligned
    tn = granule
    for cand in (16384, 8192, 4096, 2048, 1024, 512, 256, 128):
        if cand % granule:
            continue
        if _vmem_estimate(cand, pack, km, kd, itemsize) <= budget_bytes:
            tn = cand
            break
    # Don't pad a small input up to one huge tile; only force >=2 grid steps
    # on parts that actually have 2 TensorCores (v7x).
    cap = max(granule, _round_up(pl.cdiv(n, num_tc), granule))
    return max(granule, min(tn, cap))


def _choose_row_chunk(r_blk):
    for c in (256, 128, 64, 32, 16, 8):
        if r_blk % c == 0:
            return c
    return r_blk


def _pack_table(templat, pack, kd):
    num_embed, embed_dim = templat.shape
    if pack > 1:
        return jnp.kron(jnp.eye(pack, dtype=templat.dtype), templat)
    if kd != embed_dim:
        return jnp.pad(templat, ((0, 0), (0, kd - embed_dim)))
    return templat


# ----------------------------------------------------------------------------
# Feature probe: whole-array-resident VMEM input spec
# ----------------------------------------------------------------------------
_RESIDENT_VMEM_OK = None


def _resident_vmem_supported():
    """One tiny probe kernel; real lookup errors are never swallowed."""
    global _RESIDENT_VMEM_OK
    if _RESIDENT_VMEM_OK is None:
        def _probe(x_ref, t_ref, o_ref):
            o_ref[...] = x_ref[...] + t_ref[...]
        try:
            z = jnp.zeros((8, 128), jnp.float32)
            out = pl.pallas_call(
                _probe,
                out_shape=jax.ShapeDtypeStruct((8, 128), jnp.float32),
                grid=(1,),
                in_specs=[pl.BlockSpec((8, 128), lambda i: (0, 0)),
                          pl.BlockSpec(memory_space=pltpu.MemorySpace.VMEM)],
                out_specs=pl.BlockSpec((8, 128), lambda i: (0, 0)),
            )(z, z)
            jax.block_until_ready(out)
            _RESIDENT_VMEM_OK = True
        except Exception:
            _RESIDENT_VMEM_OK = False
    return _RESIDENT_VMEM_OK


# ----------------------------------------------------------------------------
# Wrapper (precomputes the packed table once per weight, caches per-shape jits)
# ----------------------------------------------------------------------------
class PallasCodebook:
    """Pallas equivalent of Codebook.forward: templat[indices]."""

    def __init__(self, templat):
        num_embed, embed_dim = templat.shape
        self.num_embed, self.embed_dim = num_embed, embed_dim
        self.dtype = templat.dtype
        itemsize = jnp.dtype(templat.dtype).itemsize

        gen, num_tc, vmem_cap = _tpu_params()
        lane_target = 256 if gen >= 6 else 128        # MXU-shape aware packing
        table_cap = (4 if gen >= 7 else 8) * _MIB     # tighter on 64 MiB parts
        self._num_tc = num_tc
        self._vmem_cap = vmem_cap
        self._budget = min(24 * _MIB, vmem_cap // 4)
        self._itemsize = itemsize

        self.pack = _choose_pack(num_embed, embed_dim, itemsize, lane_target,
                                 table_cap)
        if self.pack > 1:
            self.km, self.kd = self.pack * num_embed, self.pack * embed_dim
        else:
            self.km = num_embed
            if embed_dim % 128 != 0 and 128 % embed_dim != 0:
                self.kd = _round_up(embed_dim, 128)   # lane-dense stores
            else:
                self.kd = embed_dim

        # Hoisted: block-diagonal / padded codebook computed once per weight.
        self.table_packed = jax.device_put(_pack_table(templat, self.pack, self.kd))
        self._cache = {}

    def _build(self, n):
        fn = self._cache.get(n)
        if fn is not None:
            return fn

        pack, km, kd = self.pack, self.km, self.kd
        num_embed, embed_dim = self.num_embed, self.embed_dim
        itemsize = self._itemsize

        tn = _choose_tile(n, pack, km, kd, itemsize, self._budget, self._num_tc)
        n_pad = _round_up(n, tn)
        r_blk = tn // pack
        row_chunk = _choose_row_chunk(r_blk)
        grid = (n_pad // tn,)

        vmem_est = _vmem_estimate(tn, pack, km, kd, itemsize)
        vmem_limit = int(min(max(2 * vmem_est, 16 * _MIB),
                             min(32 * _MIB, self._vmem_cap // 2)))

        kernel = functools.partial(_embed_lookup_kernel, num_embed=num_embed,
                                   pack=pack, row_chunk=row_chunk)

        if _resident_vmem_supported():
            # Whole packed table resident once in VMEM; a constant-index block
            # doesn't need (and shouldn't pay 2x VMEM for) double buffering.
            table_spec = pl.BlockSpec(memory_space=pltpu.MemorySpace.VMEM)
        else:
            table_spec = pl.BlockSpec((km, kd), lambda i: (0, 0))

        cost = pl.CostEstimate(
            flops=2 * (n_pad // pack) * km * kd,
            transcendentals=0,
            bytes_accessed=(n_pad * 4 + km * kd * itemsize
                            + (n_pad // pack) * kd * itemsize),
        )
        cparams = pltpu.CompilerParams(
            dimension_semantics=("parallel",),
            vmem_limit_bytes=vmem_limit,
        )

        call = pl.pallas_call(
            kernel,
            out_shape=jax.ShapeDtypeStruct((n_pad // pack, kd), self.dtype),
            grid=grid,
            in_specs=[pl.BlockSpec((r_blk, pack), lambda i: (i, 0)), table_spec],
            out_specs=pl.BlockSpec((r_blk, kd), lambda i: (i, 0)),
            compiler_params=cparams,
            cost_estimate=cost,
        )

        def run(flat_idx, table_packed):
            flat_idx = jnp.pad(flat_idx.astype(jnp.int32), (0, n_pad - n))
            idx2d = flat_idx.reshape(n_pad // pack, pack)
            out = call(idx2d, table_packed)
            out = out.reshape(n_pad, kd // pack)[:n, :embed_dim]
            return out

        fn = jax.jit(run)
        self._cache[n] = fn
        return fn

    def forward(self, indices):
        orig_shape = indices.shape
        flat = indices.reshape(-1)
        n = int(flat.shape[0])
        out = self._build(n)(flat, self.table_packed)
        return out.reshape(*orig_shape, self.embed_dim)

    __call__ = forward


def codebook_forward(indices, templat):
    """One-shot convenience wrapper (prefer PallasCodebook to reuse the
    precomputed packed table across calls)."""
    return PallasCodebook(templat)(indices)


# ----------------------------------------------------------------------------
# Demo / correctness check
# ----------------------------------------------------------------------------
if __name__ == "__main__":
    key = jax.random.PRNGKey(0)
    k_w, k_i, k_i2 = jax.random.split(key, 3)

    # Module config (small, synthetic): Codebook(num_embed=32, embed_dim=32)
    num_embed, embed_dim = 32, 32
    b, h, w = 2, 8, 8

    # Deterministic init matching templat.weight.data.uniform_(-1/n, 1/n)
    templat = jax.random.uniform(
        k_w, (num_embed, embed_dim), jnp.float32,
        minval=-1.0 / num_embed, maxval=1.0 / num_embed)

    codebook = PallasCodebook(templat)

    # input: indexes in shape (b, ..) -> here (b, h, w)
    indices = jax.random.randint(k_i, (b, h, w), 0, num_embed, jnp.int32)
    out = jax.block_until_ready(codebook(indices))

    ref = jnp.take(templat, indices, axis=0)
    assert out.shape == (b, h, w, embed_dim)
    assert out.dtype == templat.dtype
    assert jnp.allclose(out, ref, atol=1e-6)

    # Second, non-tile-aligned shape to exercise padding / slicing.
    indices2 = jax.random.randint(k_i2, (3, 5), 0, num_embed, jnp.int32)
    out2 = jax.block_until_ready(codebook(indices2))
    ref2 = jnp.take(templat, indices2, axis=0)
    assert out2.shape == (3, 5, embed_dim)
    assert jnp.allclose(out2, ref2, atol=1e-6)

    print("KERNEL_OK")
</pallas_src>

<mosaic_0001>
module attributes {stable_mosaic.version = 11 : i64} {
  func.func @_probe(%arg0: i32, %arg1: memref<8x128xf32, #tpu.memory_space<vmem>>, %arg2: memref<8x128xf32, #tpu.memory_space<vmem>>, %arg3: memref<8x128xf32, #tpu.memory_space<vmem>>) attributes {dimension_semantics = [#tpu.dimension_semantics<arbitrary>], iteration_bounds = array<i64: 1>, scalar_prefetch = 0 : i64, scratch_operands = 0 : i64, tpu.core_type = #tpu.core_type<tc>, window_params = [{pipeline_mode = #tpu.pipeline_mode<synchronous>, transform_indices = @transform_0, window_bounds = array<i64: 8, 128>}, {pipeline_mode = #tpu.pipeline_mode<synchronous>, transform_indices = @transform_1, window_bounds = array<i64: 8, 128>}, {pipeline_mode = #tpu.pipeline_mode<synchronous>, transform_indices = @transform_2, window_bounds = array<i64: 8, 128>}]} {
    %c0 = arith.constant 0 : index
    %c0_0 = arith.constant 0 : index
    %0 = vector.load %arg1[%c0, %c0_0] : memref<8x128xf32, #tpu.memory_space<vmem>>, vector<8x128xf32>
    %c0_1 = arith.constant 0 : index
    %c0_2 = arith.constant 0 : index
    %1 = vector.load %arg2[%c0_1, %c0_2] : memref<8x128xf32, #tpu.memory_space<vmem>>, vector<8x128xf32>
    %2 = arith.addf %0, %1 : vector<8x128xf32>
    %c0_3 = arith.constant 0 : index
    %c0_4 = arith.constant 0 : index
    %3 = vector.load %arg3[%c0_3, %c0_4] : memref<8x128xf32, #tpu.memory_space<vmem>>, vector<8x128xf32>
    tpu.vector_store %arg3[%c0_3, %c0_4], %2 {strides = array<i32>} : memref<8x128xf32, #tpu.memory_space<vmem>>, vector<8x128xf32>,
    return
  }
  func.func @transform_0(%arg0: i32) -> (i32, i32) {
    %c0_i32 = arith.constant 0 : i32
    %c0_i32_0 = arith.constant 0 : i32
    %c0_i32_1 = arith.constant 0 : i32
    return %c0_i32, %c0_i32_0 : i32, i32
  }
  func.func @transform_1(%arg0: i32) -> (i32, i32) {
    %c0_i32 = arith.constant 0 : i32
    %c0_i32_0 = arith.constant 0 : i32
    %c0_i32_1 = arith.constant 0 : i32
    return %c0_i32, %c0_i32_0 : i32, i32
  }
  func.func @transform_2(%arg0: i32) -> (i32, i32) {
    %c0_i32 = arith.constant 0 : i32
    %c0_i32_0 = arith.constant 0 : i32
    %c0_i32_1 = arith.constant 0 : i32
    return %c0_i32, %c0_i32_0 : i32, i32
  }
}

module attributes {stable_mosaic.version = 11 : i64} {
  func.func @_embed_lookup_kernel(%arg0: i32, %arg1: memref<32x4xi32, #tpu.memory_space<vmem>>, %arg2: memref<128x128xf32, #tpu.memory_space<vmem>>, %arg3: memref<32x128xf32, #tpu.memory_space<vmem>>) attributes {dimension_semantics = [#tpu.dimension_semantics<parallel>], iteration_bounds = array<i64: 1>, scalar_prefetch = 0 : i64, scratch_operands = 0 : i64, tpu.core_type = #tpu.core_type<tc>, window_params = [{transform_indices = @transform_0, window_bounds = array<i64: 32, 4>}, {pipeline_mode = #tpu.pipeline_mode<synchronous>, transform_indices = @transform_1, window_bounds = array<i64: 128, 128>}, {transform_indices = @transform_2, window_bounds = array<i64: 32, 128>}]} {
    %c0 = arith.constant 0 : index
    %c0_0 = arith.constant 0 : index
    %0 = vector.load %arg1[%c0, %c0_0] : memref<32x4xi32, #tpu.memory_space<vmem>>, vector<32x4xi32>
    %c0_i32 = arith.constant 0 : i32
    %c31_i32 = arith.constant 31 : i32
    %1 = vector.broadcast %c0_i32 : i32 to vector<32x4xi32>
    %2 = arith.maxsi %1, %0 : vector<32x4xi32>
    %3 = vector.broadcast %c31_i32 : i32 to vector<32x4xi32>
    %4 = arith.minsi %3, %2 : vector<32x4xi32>
    %5 = tpu.iota {dimensions = array<i32: 1>} : vector<32x128xi32>
    %6 = vector.extract_strided_slice %4 {offsets = [0, 0], sizes = [32, 1], strides = [1, 1]} : vector<32x4xi32> to vector<32x1xi32>
    %7 = vector.broadcast %6 : vector<32x1xi32> to vector<32x128xi32>
    %8 = arith.cmpi eq, %5, %7 : vector<32x128xi32>
    %9 = vector.extract_strided_slice %4 {offsets = [0, 1], sizes = [32, 1], strides = [1, 1]} : vector<32x4xi32> to vector<32x1xi32>
    %c32_i32 = arith.constant 32 : i32
    %10 = vector.broadcast %c32_i32 : i32 to vector<32x1xi32>
    %11 = arith.addi %9, %10 : vector<32x1xi32>
    %12 = vector.broadcast %11 : vector<32x1xi32> to vector<32x128xi32>
    %13 = arith.cmpi eq, %5, %12 : vector<32x128xi32>
    %14 = arith.ori %8, %13 : vector<32x128xi1>
    %15 = vector.extract_strided_slice %4 {offsets = [0, 2], sizes = [32, 1], strides = [1, 1]} : vector<32x4xi32> to vector<32x1xi32>
    %c64_i32 = arith.constant 64 : i32
    %16 = vector.broadcast %c64_i32 : i32 to vector<32x1xi32>
    %17 = arith.addi %15, %16 : vector<32x1xi32>
    %18 = vector.broadcast %17 : vector<32x1xi32> to vector<32x128xi32>
    %19 = arith.cmpi eq, %5, %18 : vector<32x128xi32>
    %20 = arith.ori %14, %19 : vector<32x128xi1>
    %21 = vector.extract_strided_slice %4 {offsets = [0, 3], sizes = [32, 1], strides = [1, 1]} : vector<32x4xi32> to vector<32x1xi32>
    %c96_i32 = arith.constant 96 : i32
    %22 = vector.broadcast %c96_i32 : i32 to vector<32x1xi32>
    %23 = arith.addi %21, %22 : vector<32x1xi32>
    %24 = vector.broadcast %23 : vector<32x1xi32> to vector<32x128xi32>
    %25 = arith.cmpi eq, %5, %24 : vector<32x128xi32>
    %26 = arith.ori %20, %25 : vector<32x128xi1>
    %27 = arith.extui %26 : vector<32x128xi1> to vector<32x128xi32>
    %28 = arith.sitofp %27 : vector<32x128xi32> to vector<32x128xf32>
    %c0_1 = arith.constant 0 : index
    %c0_2 = arith.constant 0 : index
    %29 = vector.load %arg2[%c0_1, %c0_2] : memref<128x128xf32, #tpu.memory_space<vmem>>, vector<128x128xf32>
    %cst = arith.constant dense<0.000000e+00> : vector<32x128xf32>
    %30 = tpu.matmul %28, %29, %cst {dimension_numbers = #tpu.dot_dimension_numbers<[1], [0], [0], [1], [0, 0, 1, 1], [], []>} : vector<32x128xf32>, vector<128x128xf32>, vector<32x128xf32> -> vector<32x128xf32>
    %c0_3 = arith.constant 0 : index
    %c0_4 = arith.constant 0 : index
    %31 = vector.load %arg3[%c0_3, %c0_4] : memref<32x128xf32, #tpu.memory_space<vmem>>, vector<32x128xf32>
    tpu.vector_store %arg3[%c0_3, %c0_4], %30 {strides = array<i32>} : memref<32x128xf32, #tpu.memory_space<vmem>>, vector<32x128xf32>,
    return
  }
  func.func @transform_0(%arg0: i32) -> (i32, i32) {
    %c0_i32 = arith.constant 0 : i32
    %c0_i32_0 = arith.constant 0 : i32
    return %arg0, %c0_i32 : i32, i32
  }
  func.func @transform_1(%arg0: i32) -> (i32, i32) {
    %c0_i32 = arith.constant 0 : i32
    %c0_i32_0 = arith.constant 0 : i32
    %c0_i32_1 = arith.constant 0 : i32
    return %c0_i32, %c0_i32_0 : i32, i32
  }
  func.func @transform_2(%arg0: i32) -> (i32, i32) {
    %c0_i32 = arith.constant 0 : i32
    %c0_i32_0 = arith.constant 0 : i32
    return %arg0, %c0_i32 : i32, i32
  }
}

</mosaic_0001>

<bundles_post_ra>
// kernel: tpu_custom_call.1
= control target key start
LH: loop header
LB: loop body
LE: loop exit
PB: predicated region body
PF: predicated region fallthrough
CT: control target
= control target key end

     0   :  { %7 = vsyncpa [#allocation3], 0  ;;  %s170_s0 = inlined_call_operand.hbm [shape: f32[8,128], index: 0, kind: input, shape index: {}]   ;;  %s171_s1 = inlined_call_operand.hbm [shape: f32[8,128], index: 1, kind: input, shape index: {}]   ;;  %s172_s2 = inlined_call_operand.hbm [shape: f32[8,128], index: 2, kind: output, shape index: {}]  }
   0x1   :  { %8 = vsyncpa [#allocation6], 0 }
   0x2   :  { %9 = vsyncpa [#allocation4], 0  ;;  %s15_s11 = sshll.u32 %s170_s0, 4  ;;  %s143_s12 = smov [#allocation2]   ;;  %s16_s11 = int_to_ptr.hbm [resolvable:$true] %s15_s11 }
   0x3   :  { %s17_s13 = sshll.u32 %s143_s12, 4  ;;  %s26_s16 = sshll.u32 %s171_s1, 4  ;;  %s18_s13 = int_to_ptr.vmem [resolvable:$true] %s17_s13  ;;  %s27_s16 = int_to_ptr.hbm [resolvable:$true] %s26_s16 }
   0x4   :  { %20 = dma.hbm_to_vmem [thread:$0]  %s16_s11, 128, %s18_s13, [#allocation3]  }
   0x5   :  { %s144_s17 = smov [#allocation5]  }
   0x6   :  { %s28_s18 = sshll.u32 %s144_s17, 4  ;;  %s29_s18 = int_to_ptr.vmem [resolvable:$true] %s28_s18 }
   0x7   :  { %31 = dma.hbm_to_vmem [thread:$0]  %s27_s16, 128, %s29_s18, [#allocation6]  }
   0x8   :  { %137 = dma.done.wait [#allocation3], 128  }
   0x9   :  { %138 = vsyncadd [#allocation3], 4294967168 }
   0xa   :  { %139 = dma.done.wait [#allocation6], 128  }
   0xb   :  { %140 = vsyncadd [#allocation6], 4294967168  ;;  %s145_s19 = smov [#allocation7]   ;;  %s51_s22 = sshll.u32 %s172_s2, 4  ;;  %v40_v0 = vld [vmem:[#allocation2] sm:$0xff]  ;;  %v41_v1 = vld [vmem:[#allocation5] sm:$0xff]  ;;  %s52_s22 = int_to_ptr.hbm [resolvable:$true] %s51_s22 }
   0xc   :  { %s49_s0 = sshll.u32 %s145_s19, 4  ;;  %v42_v2 = vadd.f32 %v41_v1, %v40_v0  ;;  %s50_s0 = int_to_ptr.vmem [resolvable:$true] %s49_s0 }
   0xe   :  { %43 = vst [vmem:[#allocation7] sm:$0xff] %v42_v2 }
   0xf   :  { %54 = dma.vmem_to_hbm [thread:$0]  %s50_s0, 128, %s52_s22, [#allocation4]  }
  0x10   :  { %141 = dma.done.wait [#allocation4], 128  }
  0x11   :  { %142 = vsyncadd [#allocation4], 4294967168 }
  0x12   :  { %59 = vsyncpa [#allocation3], 1 }
  0x13   :  { %60 = vsyncpa [#allocation6], 1 }
  0x14   :  { %61 = vsyncpa [#allocation4], 1 }

// kernel: run.1
= control target key start
LH: loop header
LB: loop body
LE: loop exit
PB: predicated region body
PF: predicated region fallthrough
CT: control target
= control target key end

     0   :  { %7 = vsyncpa [#allocation3], 0  ;;  %s303_s12 = smov [#allocation2]   ;;  %s304_s14 = smov 128   ;;  %s353_s0 = inlined_call_operand.vmem [shape: s32[32,4], index: 0, kind: input, shape index: {}]   ;;  %s354_s1 = inlined_call_operand.hbm [shape: f32[128,128], index: 1, kind: input, shape index: {}]   ;;  %s355_s2 = inlined_call_operand.vmem [shape: f32[32,128], index: 2, kind: output, shape index: {}]  }
   0x1   :  { %s14_s11 = sshll.u32 %s354_s1, 4  ;;  %s16_s13 = sshll.u32 %s303_s12, 4  ;;  %s15_s11 = int_to_ptr.hbm [resolvable:$true] %s14_s11  ;;  %s17_s13 = int_to_ptr.vmem [resolvable:$true] %s16_s13 }
   0x2   :  { %s305_s15 = smov 8  }
   0x3   :  { %22 = dma.hbm_to_vmem [thread:$0]  %s15_s11, 2048, %s17_s13, [#allocation3], %s304_s14, %s304_s14, %s305_s15  }
   0x4   :  { %301 = dma.done.wait [#allocation3], 2048  }
   0x5   :  { %302 = vsyncadd [#allocation3], 4294965248  ;;  %v306_v0 = vmov 0   ;;  %v307_v1 = vmov 1   ;;  %v308_v2 = vmov 2   ;;  %v29_v3 = vld [vmem:[%s353_s0 + $0x10] sm:$0xff]  ;;  %v47_v49 = vlaneseq }
   0x6   :  { %263 = vset.pattern.permute.xlu0 %v306_v0  ;;  %264 = vset.pattern.permute.xlu1 %v307_v1  ;;  %v30_v4 = vld [vmem:[%s353_s0 + $0x18] sm:$0xff]  ;;  %vm35_vm0 = vcmp.gt.s32.totalorder %v29_v3, 0  ;;  %v27_v11 = vld [vmem:[%s353_s0] sm:$0xff]  ;;  %v28_v14 = vld [vmem:[%s353_s0 + $0x8] sm:$0xff]  ;;  %v309_v20 = vmov 3   ;;  %v310_v57 = vmov 1.0  }
   0x7   :  { %265 = vset.pattern.permute.xlu2 %v308_v2  ;;  %vm37_vm1 = vcmp.gt.s32.totalorder %v30_v4, 0  ;;  %v36_v5 = vsel %vm35_vm0, %v29_v3, 0  ;;  %vm31_vm4 = vcmp.gt.s32.totalorder %v27_v11, 0  ;;  %vm33_vm5 = vcmp.gt.s32.totalorder %v28_v14, 0  ;;  %v160_v18 = vld [vmem:[#allocation2 + $0x78] sm:$0xff]  ;;  %v159_v29 = vld [vmem:[#allocation2 + $0x70] sm:$0xff] }
   0x8   :  { %v38_v6 = vsel %vm37_vm1, %v30_v4, 0  ;;  %vm43_vm2 = vcmp.lt.s32.totalorder %v36_v5, 31  ;;  %v32_v15 = vsel %vm31_vm4, %v27_v11, 0  ;;  %v34_v17 = vsel %vm33_vm5, %v28_v14, 0  ;;  %208 = vmatpush.msra.mxu2 %v160_v18  ;;  %209 = vmatpush.msra.mxu3 %v160_v18  ;;  %v158_v30 = vld [vmem:[#allocation2 + $0x68] sm:$0xff]  ;;  %v157_v31 = vld [vmem:[#allocation2 + $0x60] sm:$0xff] }
   0x9   :  { %v44_v7 = vsel %vm43_vm2, %v36_v5, 31  ;;  %vm45_vm3 = vcmp.lt.s32.totalorder %v38_v6, 31  ;;  %vm39_vm6 = vcmp.lt.s32.totalorder %v32_v15, 31  ;;  %vm41_vm7 = vcmp.lt.s32.totalorder %v34_v17, 31  ;;  %207 = vmatpush.msra.mxu1 %v160_v18  ;;  %161 = vmatpush.msra.mxu0 %v160_v18  ;;  %v156_v32 = vld [vmem:[#allocation2 + $0x58] sm:$0xff]  ;;  %v155_v33 = vld [vmem:[#allocation2 + $0x50] sm:$0xff] }
   0xa   :  { %56 = vperm.xlu0 %263, %v44_v7   ;;  %v67_v8 = vadd.s32 32, %v44_v7  ;;  %v91_v9 = vadd.s32 64, %v44_v7  ;;  %v46_v10 = vsel %vm45_vm3, %v38_v6, 31  ;;  %v115_v16 = vadd.s32 96, %v44_v7  ;;  %211 = vmatpush.msra.mxu2 %v159_v29  ;;  %v154_v34 = vld [vmem:[#allocation2 + $0x48] sm:$0xff]  ;;  %v153_v35 = vld [vmem:[#allocation2 + $0x40] sm:$0xff] }
   0xb   :  { %v68_v12 = vadd.s32 32, %v46_v10  ;;  %v92_v13 = vadd.s32 64, %v46_v10  ;;  %v116_v19 = vadd.s32 96, %v46_v10  ;;  %v40_v21 = vsel %vm39_vm6, %v32_v15, 31  ;;  %212 = vmatpush.msra.mxu3 %v159_v29  ;;  %210 = vmatpush.msra.mxu1 %v159_v29  ;;  %v152_v36 = vld [vmem:[#allocation2 + $0x38] sm:$0xff]  ;;  %v151_v37 = vld [vmem:[#allocation2 + $0x30] sm:$0xff] }
   0xc   :  { %76 = vperm.xlu1 %264, %v67_v8   ;;  %100 = vperm.xlu2 %265, %v91_v9   ;;  %v42_v22 = vsel %vm41_vm7, %v34_v17, 31  ;;  %v65_v24 = vadd.s32 32, %v40_v21  ;;  %v89_v25 = vadd.s32 64, %v40_v21  ;;  %v113_v27 = vadd.s32 96, %v40_v21  ;;  %v150_v38 = vld [vmem:[#allocation2 + $0x28] sm:$0xff]  ;;  %v149_v40 = vld [vmem:[#allocation2 + $0x20] sm:$0xff] }
   0xd   :  { %v66_v23 = vadd.s32 32, %v42_v22  ;;  %v90_v26 = vadd.s32 64, %v42_v22  ;;  %v114_v28 = vadd.s32 96, %v42_v22  ;;  %162 = vmatpush.msra.mxu0 %v159_v29  ;;  %214 = vmatpush.msra.mxu2 %v158_v30  ;;  %v148_v41 = vld [vmem:[#allocation2 + $0x18] sm:$0xff]  ;;  %v147_v42 = vld [vmem:[#allocation2 + $0x10] sm:$0xff]  ;;  %v146_v43 = vld [vmem:[#allocation2 + $0x8] sm:$0xff] }
   0xe   :  { %215 = vmatpush.msra.mxu3 %v158_v30  ;;  %213 = vmatpush.msra.mxu1 %v158_v30  ;;  %v145_v45 = vld [vmem:[#allocation2] sm:$0xff]  ;;  %v48_v51 = vand.u32 127, %v47_v49 }
   0xf   :  { %163 = vmatpush.msra.mxu0 %v158_v30  ;;  %217 = vmatpush.msra.mxu2 %v157_v31 }
  0x10   :  { %218 = vmatpush.msra.mxu3 %v157_v31  ;;  %216 = vmatpush.msra.mxu1 %v157_v31 }
  0x11   :  { %164 = vmatpush.msra.mxu0 %v157_v31  ;;  %220 = vmatpush.msra.mxu2 %v156_v32 }
  0x12   :  { %59 = vperm.xlu0 %263, %v46_v10   ;;  %221 = vmatpush.msra.mxu3 %v156_v32 }
  0x13   :  { %219 = vmatpush.msra.mxu1 %v156_v32  ;;  %165 = vmatpush.msra.mxu0 %v156_v32 }
  0x14   :  { %79 = vperm.xlu1 %264, %v68_v12   ;;  %103 = vperm.xlu2 %265, %v92_v13  }
  0x15   :  { %223 = vmatpush.msra.mxu2 %v155_v33  ;;  %224 = vmatpush.msra.mxu3 %v155_v33 }
  0x16   :  { %222 = vmatpush.msra.mxu1 %v155_v33  ;;  %166 = vmatpush.msra.mxu0 %v155_v33 }
  0x17   :  { %226 = vmatpush.msra.mxu2 %v154_v34  ;;  %227 = vmatpush.msra.mxu3 %v154_v34 }
  0x18   :  { %225 = vmatpush.msra.mxu1 %v154_v34  ;;  %167 = vmatpush.msra.mxu0 %v154_v34 }
  0x19   :  { %229 = vmatpush.msra.mxu2 %v153_v35  ;;  %230 = vmatpush.msra.mxu3 %v153_v35 }
  0x1a   :  { %266 = vset.pattern.permute.xlu0 %v309_v20  ;;  %228 = vmatpush.msra.mxu1 %v153_v35 }
  0x1b   :  { %124 = vperm.xlu0 %266, %v115_v16   ;;  %168 = vmatpush.msra.mxu0 %v153_v35 }
  0x1c   :  { %267 = vset.pattern.permute.xlu1 %v309_v20  ;;  %268 = vset.pattern.permute.xlu2 %v306_v0 }
  0x1d   :  { %127 = vperm.xlu1 %267, %v116_v19   ;;  %50 = vperm.xlu2 %268, %v40_v21  }
  0x1e   :  { %232 = vmatpush.msra.mxu2 %v152_v36  ;;  %233 = vmatpush.msra.mxu3 %v152_v36 }
  0x1f   :  { %231 = vmatpush.msra.mxu1 %v152_v36  ;;  %169 = vmatpush.msra.mxu0 %v152_v36 }
  0x20   :  { %235 = vmatpush.msra.mxu2 %v151_v37  ;;  %236 = vmatpush.msra.mxu3 %v151_v37 }
  0x21   :  { %234 = vmatpush.msra.mxu1 %v151_v37  ;;  %170 = vmatpush.msra.mxu0 %v151_v37 }
  0x22   :  { %238 = vmatpush.msra.mxu2 %v150_v38  ;;  %239 = vmatpush.msra.mxu3 %v150_v38 }
  0x23   :  { %271 = vset.pattern.permute.xlu0 %v307_v1  ;;  %237 = vmatpush.msra.mxu1 %v150_v38 }
  0x24   :  { %73 = vperm.xlu0 %271, %v66_v23   ;;  %171 = vmatpush.msra.mxu0 %v150_v38 }
  0x25   :  { %269 = vset.pattern.permute.xlu1 %v306_v0  ;;  %270 = vset.pattern.permute.xlu2 %v307_v1 }
  0x26   :  { %53 = vperm.xlu1 %269, %v42_v22   ;;  %70 = vperm.xlu2 %270, %v65_v24  }
  0x27   :  { %241 = vmatpush.msra.mxu2 %v149_v40  ;;  %242 = vmatpush.msra.mxu3 %v149_v40 }
  0x28   :  { %240 = vmatpush.msra.mxu1 %v149_v40  ;;  %172 = vmatpush.msra.mxu0 %v149_v40 }
  0x29   :  { %244 = vmatpush.msra.mxu2 %v148_v41  ;;  %245 = vmatpush.msra.mxu3 %v148_v41 }
  0x2a   :  { %243 = vmatpush.msra.mxu1 %v148_v41  ;;  %173 = vmatpush.msra.mxu0 %v148_v41 }
  0x2b   :  { %247 = vmatpush.msra.mxu2 %v147_v42  ;;  %248 = vmatpush.msra.mxu3 %v147_v42 }
  0x2c   :  { %276 = vset.pattern.permute.xlu0 %v309_v20  ;;  %246 = vmatpush.msra.mxu1 %v147_v42 }
  0x2d   :  { %174 = vmatpush.msra.mxu0 %v147_v42  ;;  %250 = vmatpush.msra.mxu2 %v146_v43 }
  0x2e   :  { %272 = vset.pattern.permute.xlu1 %v308_v2  ;;  %273 = vset.pattern.permute.xlu2 %v308_v2 }
  0x2f   :  { %94 = vperm.xlu1 %272, %v89_v25   ;;  %97 = vperm.xlu2 %273, %v90_v26  }
  0x30   :  { %251 = vmatpush.msra.mxu3 %v146_v43  ;;  %249 = vmatpush.msra.mxu1 %v146_v43 }
  0x31   :  { %175 = vmatpush.msra.mxu0 %v146_v43  ;;  %253 = vmatpush.msra.mxu2 %v145_v45 }
  0x32   :  { %254 = vmatpush.msra.mxu3 %v145_v45  ;;  %252 = vmatpush.msra.mxu1 %v145_v45 }
  0x33   :  { %176 = vmatpush.msra.mxu0 %v145_v45 }
  0x37   :  { %274 = vset.pattern.permute.xlu1 %v309_v20  ;;  %275 = vset.pattern.permute.xlu2 %v309_v20 }
  0x38   :  { %118 = vperm.xlu1 %274, %v113_v27   ;;  %121 = vperm.xlu2 %275, %v114_v28  }
  0x66   :  { %v101_v39 = vpop.permute.xlu2 %100 }
  0x67   :  { %vm107_vm12 = vcmp.eq.s32.totalorder %v48_v51, %v101_v39 }
  0x6e   :  { %v104_v44 = vpop.permute.xlu2 %103 }
  0x6f   :  { %vm108_vm1 = vcmp.eq.s32.totalorder %v48_v51, %v104_v44 }
  0x77   :  { %v51_v46 = vpop.permute.xlu2 %50 }
  0x7c   :  { %v57_v47 = vpop.permute.xlu0 %56 }
  0x7d   :  { %vm63_vm8 = vcmp.eq.s32.totalorder %v48_v51, %v57_v47 }
  0x7e   :  { %v77_v48 = vpop.permute.xlu1 %76 }
  0x7f   :  { %vm83_vm9 = vcmp.eq.s32.totalorder %v48_v51, %v77_v48 }
  0x80   :  { %v71_v50 = vpop.permute.xlu2 %70  ;;  %vm87_vm13 = vmor %vm63_vm8, %vm83_vm9 }
  0x81   :  { %vm111_vm15 = vmor %vm87_vm13, %vm107_vm12  ;;  %vm61_vm13 = vcmp.eq.s32.totalorder %v48_v51, %v51_v46 }
  0x84   :  { %v60_v52 = vpop.permute.xlu0 %59 }
  0x85   :  { %vm64_vm10 = vcmp.eq.s32.totalorder %v48_v51, %v60_v52 }
  0x86   :  { %v80_v53 = vpop.permute.xlu1 %79 }
  0x87   :  { %vm84_vm11 = vcmp.eq.s32.totalorder %v48_v51, %v80_v53 }
  0x88   :  { %vm88_vm14 = vmor %vm64_vm10, %vm84_vm11 }
  0x89   :  { %v98_v54 = vpop.permute.xlu2 %97  ;;  %vm112_vm3 = vmor %vm88_vm14, %vm108_vm1 }
  0x8a   :  { %vm106_vm7 = vcmp.eq.s32.totalorder %v48_v51, %v98_v54 }
  0x8d   :  { %v125_v55 = vpop.permute.xlu0 %124 }
  0x8e   :  { %vm131_vm0 = vcmp.eq.s32.totalorder %v48_v51, %v125_v55 }
  0x8f   :  { %vm135_vm2 = vmor %vm111_vm15, %vm131_vm0  ;;  %v128_v56 = vpop.permute.xlu1 %127  ;;  %vm81_vm15 = vcmp.eq.s32.totalorder %v48_v51, %v71_v50 }
  0x90   :  { %vm132_vm4 = vcmp.eq.s32.totalorder %v48_v51, %v128_v56  ;;  %205 = vmatmul.msk.f32.vlgmr.msra.gmra.mxu2 %vm135_vm2, %v310_v57  ;;  %vm85_vm0 = vmor %vm61_vm13, %vm81_vm15 }
  0x91   :  { %vm136_vm5 = vmor %vm112_vm3, %vm132_vm4 }
  0x92   :  { %206 = vmatmul.msk.f32.vlgmr.msra.gmra.mxu3 %vm136_vm5, %v310_v57  ;;  %v122_v59 = vpop.permute.xlu2 %121 }
  0x93   :  { %vm130_vm9 = vcmp.eq.s32.totalorder %v48_v51, %v122_v59 }
  0x96   :  { %v74_v58 = vpop.permute.xlu0 %73 }
  0x97   :  { %vm82_vm6 = vcmp.eq.s32.totalorder %v48_v51, %v74_v58 }
  0x98   :  { %v54_v60 = vpop.permute.xlu1 %53 }
  0x99   :  { %vm62_vm8 = vcmp.eq.s32.totalorder %v48_v51, %v54_v60 }
  0x9a   :  { %vm86_vm10 = vmor %vm62_vm8, %vm82_vm6 }
  0x9b   :  { %vm110_vm11 = vmor %vm86_vm10, %vm106_vm7 }
  0x9c   :  { %vm134_vm12 = vmor %vm110_vm11, %vm130_vm9 }
  0x9d   :  { %204 = vmatmul.msk.f32.vlgmr.msra.gmra.mxu1 %vm134_vm12, %v310_v57 }
  0xa1   :  { %v95_v61 = vpop.permute.xlu1 %94 }
  0xa2   :  { %vm105_vm14 = vcmp.eq.s32.totalorder %v48_v51, %v95_v61 }
  0xa3   :  { %vm109_vm1 = vmor %vm85_vm0, %vm105_vm14 }
  0xaa   :  { %v119_v62 = vpop.permute.xlu1 %118 }
  0xab   :  { %vm129_vm2 = vcmp.eq.s32.totalorder %v48_v51, %v119_v62 }
  0xac   :  { %vm133_vm3 = vmor %vm109_vm1, %vm129_vm2 }
  0xad   :  { %203 = vmatmul.msk.f32.vlgmr.msra.gmra.mxu0 %vm133_vm3, %v310_v57 }
 0x113   :  { %v184_v63 = vpop.f32.mrf.mxu2 }
 0x114   :  { %192 = vst [vmem:[%s355_s2 + $0x10] sm:$0xff] %v184_v63 }
 0x115   :  { %v187_v0 = vpop.f32.mrf.mxu3 }
 0x116   :  { %193 = vst [vmem:[%s355_s2 + $0x18] sm:$0xff] %v187_v0 }
 0x11a   :  { %v181_v1 = vpop.f32.mrf.mxu1 }
 0x11b   :  { %191 = vst [vmem:[%s355_s2 + $0x8] sm:$0xff] %v181_v1 }
 0x12a   :  { %v178_v2 = vpop.f32.mrf.mxu0 }
 0x12b   :  { %190 = vst [vmem:[%s355_s2] sm:$0xff] %v178_v2 }
 0x12c   :  { %198 = vsyncpa [#allocation3], 1 }

</bundles_post_ra>
